<compile_context>
chip_gen: v5e
topology: v5e:2x2
jax: 0.10.0
libtpu: 0.0.40
codegen_flags: <defaults>
</compile_context>

<pallas_src>
import functools

import jax
import jax.numpy as jnp
from jax.experimental import pallas as pl
from jax.experimental.pallas import tpu as pltpu


# ----------------------------- kernel ---------------------------------------

def _make_kernel(d_total, tk, need_k_mask):
    """Build the kernel with static knowledge of the true feature dim."""

    def kernel(x_ref, w_ref, b_ref, o_ref, acc_ref):
        # x_ref: (TB, TK) VMEM     w_ref: (1, TK) VMEM (lane-dense row)
        # b_ref: (1, 1) SMEM       o_ref: (TB, 1) VMEM
        # acc_ref: (TB, 1) f32 VMEM scratch, resident across the K axis
        k = pl.program_id(1)

        @pl.when(k == 0)
        def _init():
            acc_ref[...] = jnp.zeros_like(acc_ref)

        x = x_ref[...].astype(jnp.float32)
        if need_k_mask:
            # K-tail block reads OOB garbage (can be NaN/Inf); select it away
            # before it can poison valid rows' accumulators.
            col = jax.lax.broadcasted_iota(jnp.int32, x.shape, 1) + k * tk
            x = jnp.where(col < d_total, x, 0.0)

        w = w_ref[...].astype(jnp.float32)                      # (1, TK)
        # VPU multiply + cross-lane sum: exact f32 partial matvec.
        acc_ref[...] += jnp.sum(x * w, axis=1, keepdims=True)

        @pl.when(k == pl.num_programs(1) - 1)
        def _finalize():
            z = acc_ref[...] + b_ref[0, 0]
            o_ref[...] = jax.nn.sigmoid(z).astype(o_ref.dtype)

    return kernel


# --------------------------- tile selection ----------------------------------

def _cdiv(a, m):
    return -(-a // m)


def _round_up(a, m):
    return _cdiv(a, m) * m


def _chip_info():
    """(vmem_capacity_bytes, is_v7x) with conservative fallbacks."""
    vmem_cap = 64 << 20          # conservative default (v7x per-TensorCore)
    is_v7x = False
    try:
        kind = jax.devices()[0].device_kind.lower()
        is_v7x = "v7" in kind
        if not is_v7x:
            vmem_cap = 128 << 20  # v4/v5e/v6e physical VMEM
    except Exception:
        pass
    try:
        cap = int(pltpu.get_tpu_info().vmem_capacity_bytes)
        if cap > 0:
            vmem_cap = cap
    except Exception:
        pass
    return vmem_cap, is_v7x


def _choose_tiles(B, D, itemsize):
    """Pick (tb, tk, vmem_limit) per chip generation.

    tb / tk only need to satisfy the layout constraint (multiple of the
    sublane tile / of 128, or equal to the full dim); the grid uses cdiv so
    no wrapper-side padding of x is ever required.
    """
    sub = 8 if itemsize >= 4 else (16 if itemsize == 2 else 32)
    vmem_cap, is_v7x = _chip_info()

    # Raise v5e's 16 MiB scoped default; stay well under physical capacity
    # (-> 64 MiB on v5e/v6e, 32 MiB on v7x's 64 MiB part).
    vmem_limit = min(vmem_cap // 2, 64 << 20)
    # Budget for the double-buffered x stream (the dominant HBM traffic).
    x_budget = (vmem_limit * 3) // 4
    target_tb = 2048 if x_budget >= (32 << 20) else 1024

    # Default: no K tiling (block spans the full feature dim).
    tk = D
    tb_cap = max(sub, (x_budget // (2 * max(tk, 1) * itemsize)) // sub * sub)
    if tb_cap < 256 and D > 128:
        # Feature dim too wide for a bandwidth-efficient batch tile: tile K
        # with *balanced* 128-multiple chunks instead of shrinking tb.
        tk_max = 4096 if x_budget >= (32 << 20) else 2048
        d_ceil = _round_up(D, 128)
        num_k = _cdiv(d_ceil, tk_max)
        tk = _round_up(_cdiv(d_ceil, num_k), 128)
        tb_cap = max(sub, (x_budget // (2 * tk * itemsize)) // sub * sub)

    b_ceil = _round_up(B, sub)
    tb = max(sub, min(target_tb, tb_cap, b_ceil))

    if is_v7x and b_ceil >= 4 * 512:
        # Two TensorCores: give each >=2 parallel tiles so the per-core DMA
        # pipeline overlaps, but never drop below ~512-row tiles.
        tb = min(tb, max(512, _round_up(_cdiv(b_ceil, 4), sub)))
    # (v5e / v6e: single TensorCore -> never force extra grid steps.)

    return tb, tk, vmem_limit


# ------------------------------ wrapper --------------------------------------

def logistic_regression(x, weight, bias):
    """x: (B, D); weight: (1, D) (nn.Linear layout); bias: (1,)  ->  (B, 1)."""
    B, D = x.shape
    itemsize = jnp.dtype(x.dtype).itemsize
    tb, tk, vmem_limit = _choose_tiles(B, D, itemsize)

    num_b = _cdiv(B, tb)
    num_k = _cdiv(D, tk)
    Dk = num_k * tk                      # padded feature extent (weight only)

    # Lane-dense weight row; pad only this tiny (1, D) array along K.
    w_row = weight.reshape(1, D).astype(jnp.float32)
    if Dk != D:
        w_row = jnp.pad(w_row, ((0, 0), (0, Dk - D)))
    b2 = bias.reshape(1, 1).astype(jnp.float32)

    kernel = _make_kernel(D, tk, need_k_mask=(Dk != D))

    out = pl.pallas_call(
        kernel,
        out_shape=jax.ShapeDtypeStruct((B, 1), x.dtype),
        grid_spec=pltpu.PrefetchScalarGridSpec(
            num_scalar_prefetch=0,
            grid=(num_b, num_k),
            in_specs=[
                # x streamed over batch (parallel) and K (arbitrary); no
                # wrapper-side padding -- cdiv grid + in-kernel K-tail mask.
                pl.BlockSpec((tb, tk), lambda i, k: (i, k)),
                # lane-dense weight row, constant over batch.
                pl.BlockSpec((1, tk), lambda i, k: (0, k)),
                # bias scalar in SMEM.
                pl.BlockSpec((1, 1), lambda i, k: (0, 0),
                             memory_space=pltpu.SMEM),
            ],
            # Output block is constant along K -> per-tile result slab.
            out_specs=pl.BlockSpec((tb, 1), lambda i, k: (i, 0)),
            scratch_shapes=[pltpu.VMEM((tb, 1), jnp.float32)],
        ),
        compiler_params=pltpu.CompilerParams(
            dimension_semantics=("parallel", "arbitrary"),
            vmem_limit_bytes=vmem_limit,
        ),
    )(x, w_row, b2)

    return out


# ------------------------------- demo ----------------------------------------

if __name__ == "__main__":
    key = jax.random.PRNGKey(0)
    kx, kw, kb = jax.random.split(key, 3)

    batch, input_dim = 8, 32
    x = jax.random.normal(kx, (batch, input_dim), dtype=jnp.float32)

    # Deterministic parameter init (mimics nn.Linear's uniform(-1/sqrt(D), 1/sqrt(D)))
    bound = 1.0 / (input_dim ** 0.5)
    weight = jax.random.uniform(kw, (1, input_dim), jnp.float32, -bound, bound)
    bias = jax.random.uniform(kb, (1,), jnp.float32, -bound, bound)

    out = logistic_regression(x, weight, bias)
    out = jax.block_until_ready(out)

    # Reference check in plain JAX.
    ref = jax.nn.sigmoid(x @ weight.T + bias)
    assert out.shape == (batch, 1)
    assert jnp.allclose(out, ref, atol=1e-5, rtol=1e-5)

    print("KERNEL_OK")
</pallas_src>

<mosaic_0001>
module attributes {stable_mosaic.version = 11 : i64} {
  func.func @kernel(%arg0: i32, %arg1: i32, %arg2: memref<8x32xf32, #tpu.memory_space<vmem>>, %arg3: memref<1x32xf32, #tpu.memory_space<vmem>>, %arg4: memref<1x1xf32, #tpu.memory_space<smem>>, %arg5: memref<8x1xf32, #tpu.memory_space<vmem>>, %arg6: memref<8x1xf32, #tpu.memory_space<vmem>>) attributes {dimension_semantics = [#tpu.dimension_semantics<parallel>, #tpu.dimension_semantics<arbitrary>], iteration_bounds = array<i64: 1, 1>, scalar_prefetch = 0 : i64, scratch_operands = 1 : i64, tpu.core_type = #tpu.core_type<tc>, window_params = [{transform_indices = @transform_0, window_bounds = array<i64: 8, 32>}, {transform_indices = @transform_1, window_bounds = array<i64: 1, 32>}, {transform_indices = @transform_2, window_bounds = array<i64: 1, 1>}, {transform_indices = @transform_3, window_bounds = array<i64: 8, 1>}]} {
    %c0_i32 = arith.constant 0 : i32
    %0 = arith.cmpi eq, %arg1, %c0_i32 : i32
    %1 = arith.extui %0 : i1 to i32
    %c0_i32_0 = arith.constant 0 : i32
    %2 = arith.cmpi ne, %1, %c0_i32_0 : i32
    scf.if %2 {
      %cst_10 = arith.constant 0.000000e+00 : f32
      %15 = vector.broadcast %cst_10 : f32 to vector<8x1xf32>
      %c0_11 = arith.constant 0 : index
      %c0_12 = arith.constant 0 : index
      %16 = vector.load %arg6[%c0_11, %c0_12] : memref<8x1xf32, #tpu.memory_space<vmem>>, vector<8x1xf32>
      tpu.vector_store %arg6[%c0_11, %c0_12], %15 {strides = array<i32>} : memref<8x1xf32, #tpu.memory_space<vmem>>, vector<8x1xf32>,
    } else {
    }
    %c0 = arith.constant 0 : index
    %c0_1 = arith.constant 0 : index
    %3 = vector.load %arg2[%c0, %c0_1] : memref<8x32xf32, #tpu.memory_space<vmem>>, vector<8x32xf32>
    %c0_2 = arith.constant 0 : index
    %c0_3 = arith.constant 0 : index
    %4 = vector.load %arg3[%c0_2, %c0_3] : memref<1x32xf32, #tpu.memory_space<vmem>>, vector<1x32xf32>
    %c0_4 = arith.constant 0 : index
    %c0_5 = arith.constant 0 : index
    %5 = vector.load %arg6[%c0_4, %c0_5] : memref<8x1xf32, #tpu.memory_space<vmem>>, vector<8x1xf32>
    %6 = vector.broadcast %4 : vector<1x32xf32> to vector<8x32xf32>
    %7 = arith.mulf %3, %6 : vector<8x32xf32>
    %cst = arith.constant dense<0.000000e+00> : vector<8xf32>
    %8 = vector.multi_reduction <add>, %7, %cst [1] : vector<8x32xf32> to vector<8xf32>
    %9 = vector.shape_cast %8 : vector<8xf32> to vector<8x1xf32>
    %10 = arith.addf %5, %9 : vector<8x1xf32>
    %c0_6 = arith.constant 0 : index
    %c0_7 = arith.constant 0 : index
    %11 = vector.load %arg6[%c0_6, %c0_7] : memref<8x1xf32, #tpu.memory_space<vmem>>, vector<8x1xf32>
    tpu.vector_store %arg6[%c0_6, %c0_7], %10 {strides = array<i32>} : memref<8x1xf32, #tpu.memory_space<vmem>>, vector<8x1xf32>,
    %c0_i32_8 = arith.constant 0 : i32
    %12 = arith.cmpi eq, %arg1, %c0_i32_8 : i32
    %13 = arith.extui %12 : i1 to i32
    %c0_i32_9 = arith.constant 0 : i32
    %14 = arith.cmpi ne, %13, %c0_i32_9 : i32
    scf.if %14 {
      %c0_10 = arith.constant 0 : index
      %c0_11 = arith.constant 0 : index
      %15 = vector.load %arg6[%c0_10, %c0_11] : memref<8x1xf32, #tpu.memory_space<vmem>>, vector<8x1xf32>
      %c0_12 = arith.constant 0 : index
      %c0_13 = arith.constant 0 : index
      %16 = memref.load %arg4[%c0_12, %c0_13] : memref<1x1xf32, #tpu.memory_space<smem>>
      %17 = vector.broadcast %16 : f32 to vector<8x1xf32>
      %18 = arith.addf %15, %17 : vector<8x1xf32>
      %19 = arith.negf %18 : vector<8x1xf32>
      %20 = math.exp %19 : vector<8x1xf32>
      %cst_14 = arith.constant 1.000000e+00 : f32
      %21 = vector.broadcast %cst_14 : f32 to vector<8x1xf32>
      %22 = arith.addf %21, %20 : vector<8x1xf32>
      %23 = arith.divf %21, %22 : vector<8x1xf32>
      %c0_15 = arith.constant 0 : index
      %c0_16 = arith.constant 0 : index
      %24 = vector.load %arg5[%c0_15, %c0_16] : memref<8x1xf32, #tpu.memory_space<vmem>>, vector<8x1xf32>
      tpu.vector_store %arg5[%c0_15, %c0_16], %23 {strides = array<i32>} : memref<8x1xf32, #tpu.memory_space<vmem>>, vector<8x1xf32>,
    } else {
    }
    return
  }
  func.func @transform_0(%arg0: i32, %arg1: i32) -> (i32, i32) {
    %c0_i32 = arith.constant 0 : i32
    return %arg0, %arg1 : i32, i32
  }
  func.func @transform_1(%arg0: i32, %arg1: i32) -> (i32, i32) {
    %c0_i32 = arith.constant 0 : i32
    %c0_i32_0 = arith.constant 0 : i32
    return %c0_i32, %arg1 : i32, i32
  }
  func.func @transform_2(%arg0: i32, %arg1: i32) -> (i32, i32) {
    %c0_i32 = arith.constant 0 : i32
    %c0_i32_0 = arith.constant 0 : i32
    %c0_i32_1 = arith.constant 0 : i32
    return %c0_i32, %c0_i32_0 : i32, i32
  }
  func.func @transform_3(%arg0: i32, %arg1: i32) -> (i32, i32) {
    %c0_i32 = arith.constant 0 : i32
    %c0_i32_0 = arith.constant 0 : i32
    return %arg0, %c0_i32 : i32, i32
  }
}

</mosaic_0001>

<bundles_post_ra>
// kernel: tpu_custom_call.1
= control target key start
LH: loop header
LB: loop body
LE: loop exit
PB: predicated region body
PF: predicated region fallthrough
CT: control target
= control target key end

     0   :  { %9 = vsyncpa [#allocation5], 0  ;;  %s115_s15 = smov [#allocation4]   ;;  %s152_s0 = inlined_call_operand.hbm [shape: f32[8,32], index: 0, kind: input, shape index: {}]   ;;  %s153_s1 = inlined_call_operand.vmem [shape: f32[1,32], index: 1, kind: input, shape index: {}]   ;;  %s154_s2 = inlined_call_operand.<no memory space> [shape: f32[1,1], index: 2, kind: input, shape index: {}]   ;;  %s155_s3 = inlined_call_operand.vmem [shape: f32[8,1], index: 3, kind: output, shape index: {}]  }
   0x1   :  { %s15_s14 = sshll.u32 %s152_s0, 4  ;;  %s17_s16 = sshll.u32 %s115_s15, 4  ;;  %s16_s14 = int_to_ptr.hbm [resolvable:$true] %s15_s14  ;;  %s18_s16 = int_to_ptr.vmem [resolvable:$true] %s17_s16 }
   0x2   :  { %20 = dma.hbm_to_vmem [thread:$0]  %s16_s14, 128, %s18_s16, [#allocation5]  }
   0x3   :  { %113 = dma.done.wait [#allocation5], 128  }
   0x4   :  { %114 = vsyncadd [#allocation5], 4294967168  ;;  %vm33_vm0 = vcmask 7168   ;;  %v116_v0 = vmov 0.0   ;;  %v35_v1 = vld [vmem:[#allocation4] sm:$0xff]  ;;  %vm42_vm1 = vcmask 261120   ;;  %v54_v8 = vstv %s154_s2 }
   0x5   :  { %34 = vst.msk [vmem:[#allocation2] sm:$0xff] %vm33_vm0, %v116_v0  ;;  %v84_v2 = vld [vmem:[%s153_s1] ss:$0 sm:$0xff] }
   0x6   :  { %v41_v3 = vmul.f32 %v84_v2, %v35_v1 }
   0x8   :  { %v43_v4 = vsel %vm42_vm1, %v41_v3, 0.0 }
   0x9   :  { %44 = vadd.xlane.f32.xlu0 %v43_v4 }
   0xc   :  { %v37_v5 = vld [vmem:[#allocation2] sm:$0xff] }
  0x7c   :  { %v45_v6 = vpop.xlane.xlu0 %44 }
  0x7d   :  { %v46_v7 = vadd.f32 %v45_v6, %v37_v5 }
  0x7f   :  { %48 = vst.msk [vmem:[#allocation2] sm:$0xff] %vm33_vm0, %v46_v7 }
  0x86   :  { %v52_v9 = vld [vmem:[#allocation2] sm:$0xff] }
  0x87   :  { %v55_v10 = vadd.f32 %v54_v8, %v52_v9 }
  0x89   :  { %v81_v11 = vmul.f32 -1.442695, %v55_v10 }
  0x8b   :  { %85 = vpow2.f32 %v81_v11 }
  0x91   :  { %v86_v12 = vpop.eup %85 }
  0x92   :  { %v59_v13 = vadd.f32 1.0, %v86_v12 }
  0x94   :  { %87 = vrcp.f32 %v59_v13  ;;  %v71_v17 = vand.u32 2147483648, %v59_v13  ;;  %v69_v19 = vand.u32 2147483647, %v59_v13  ;;  %vm65_vm3 = vweird.f32 %v59_v13 }
  0x96   :  { %v72_v21 = vor.u32 1.1754944e-38, %v71_v17  ;;  %vm70_vm5 = vcmp.eq.f32.partialorder %v69_v19, 8.507059e+37 }
  0x9a   :  { %v88_v14 = vpop.eup %87 }
  0x9b   :  { %v61_v15 = vmul.f32 %v88_v14, %v59_v13  ;;  %vm66_vm2 = vweird.f32 %v88_v14 }
  0x9c   :  { %vm67_vm4 = vmor %vm65_vm3, %vm66_vm2 }
  0x9d   :  { %v62_v16 = vsub.f32 1.0, %v61_v15 }
  0x9f   :  { %v63_v18 = vmul.f32 %v88_v14, %v62_v16 }
  0xa1   :  { %v64_v20 = vadd.f32 %v88_v14, %v63_v18 }
  0xa3   :  { %v68_v22 = vsel %vm67_vm4, %v88_v14, %v64_v20 }
  0xa4   :  { %v73_v23 = vsel %vm70_vm5, %v72_v21, %v68_v22 }
  0xa5   :  { %75 = vst.msk [vmem:[%s155_s3] sm:$0xff] %vm33_vm0, %v73_v23 }
  0xa6   :  { %80 = vsyncpa [#allocation5], 1 }

</bundles_post_ra>
